<compile_context>
chip_gen: v6e
topology: v6e:2x2x1
jax: 0.10.0
libtpu: 0.0.40
codegen_flags: <defaults>
</compile_context>

<pallas_src>
import jax
import jax.numpy as jnp
import numpy as np
from jax.experimental import pallas as pl
from jax.experimental.pallas import tpu as pltpu

LAYERS = [2, 50, 50, 50, 1]
HPAD = 64        # padded hidden width  (sublane axis; 50 -> 64)
IN_PAD = 8       # padded input rows    (rows 0,1 = x,t)
OUT_PAD = 8      # padded output rows   (row 0 = prediction)
TM = 512         # batch tile on the lane axis (multiple of 128)


def pinn_kernel(xin_ref,
                w1_ref, b1_ref,
                w2_ref, b2_ref,
                w3_ref, b3_ref,
                w4_ref, b4_ref,
                out_ref):
    xin = xin_ref[...]                       # (IN_PAD, TM) f32
    x_row = xin[0:1, :]                      # (1, TM)
    t_row = xin[1:2, :]                      # (1, TM)

    # Layer 1 (2 -> 50) on the VPU: two broadcast FMAs instead of a K=2
    # matmul that would be almost entirely zeros.
    w1 = w1_ref[...]                         # (HPAD, IN_PAD) f32, cols 0,1 real
    h = jnp.tanh(w1[:, 0:1] * x_row + w1[:, 1:2] * t_row + b1_ref[...])  # (HPAD, TM) f32

    # Hidden layers 2, 3 on the MXU: bf16 operands, f32 accumulate. Padded
    # rows/cols 50..63 are zero and tanh(0)=0, so the padding stays inert.
    h = jnp.tanh(
        jnp.dot(w2_ref[...], h.astype(jnp.bfloat16),
                preferred_element_type=jnp.float32) + b2_ref[...])
    h = jnp.tanh(
        jnp.dot(w3_ref[...], h.astype(jnp.bfloat16),
                preferred_element_type=jnp.float32) + b3_ref[...])

    # Output layer (50 -> 1), f32 for output precision: only row 0 of W4^T is
    # real; the (OUT_PAD, TM) result is a lane-dense (unmasked) store.
    out_ref[...] = (
        jnp.dot(w4_ref[...], h, preferred_element_type=jnp.float32)
        + b4_ref[...])


def init_params(key, layers):
    """PyTorch nn.Linear default init: U(-1/sqrt(fan_in), 1/sqrt(fan_in))."""
    params = []
    for i in range(len(layers) - 1):
        fan_in, fan_out = layers[i], layers[i + 1]
        key, kw, kb = jax.random.split(key, 3)
        bound = 1.0 / np.sqrt(fan_in)
        # stored as (in, out) so the reference computes x @ W
        W = jax.random.uniform(kw, (fan_in, fan_out), jnp.float32, -bound, bound)
        b = jax.random.uniform(kb, (fan_out,), jnp.float32, -bound, bound)
        params.append((W, b))
    return params


def pad_params(params):
    """Transpose + zero-pad the [2,50,50,50,1] weights into the
    features-on-sublanes layout. Call ONCE at init (hoisted out of forward)."""
    (W1, b1), (W2, b2), (W3, b3), (W4, b4) = params
    W1p = jnp.zeros((HPAD, IN_PAD), jnp.float32
                    ).at[:W1.shape[1], :W1.shape[0]].set(W1.T)
    b1p = jnp.zeros((HPAD, 1), jnp.float32).at[:b1.shape[0], 0].set(b1)
    W2p = jnp.zeros((HPAD, HPAD), jnp.bfloat16
                    ).at[:W2.shape[1], :W2.shape[0]].set(W2.T.astype(jnp.bfloat16))
    b2p = jnp.zeros((HPAD, 1), jnp.float32).at[:b2.shape[0], 0].set(b2)
    W3p = jnp.zeros((HPAD, HPAD), jnp.bfloat16
                    ).at[:W3.shape[1], :W3.shape[0]].set(W3.T.astype(jnp.bfloat16))
    b3p = jnp.zeros((HPAD, 1), jnp.float32).at[:b3.shape[0], 0].set(b3)
    W4p = jnp.zeros((OUT_PAD, HPAD), jnp.float32
                    ).at[:W4.shape[1], :W4.shape[0]].set(W4.T)
    b4p = jnp.zeros((OUT_PAD, 1), jnp.float32).at[:b4.shape[0], 0].set(b4)
    return [W1p, b1p, W2p, b2p, W3p, b3p, W4p, b4p]


def pinn_forward(x, t, padded_params, tm=TM):
    """x, t: (N, 1) float32 -> (N, 1) float32. padded_params = pad_params(...).

    Any N works (batch padded to a multiple of tm). For v7x pick tm so that
    ceil(N/tm) >= 2 whenever N > tm, so both TensorCores get a grid step."""
    N = x.shape[0]
    n_pad = pl.cdiv(N, tm) * tm

    # (IN_PAD, n_pad) slab: row 0 = x, row 1 = t, everything else zero.
    # Single concatenate + pad (padded batch lanes are sliced off below).
    xt = jnp.concatenate([x.astype(jnp.float32), t.astype(jnp.float32)],
                         axis=1).T                       # (2, N)
    xin = jnp.pad(xt, ((0, IN_PAD - 2), (0, n_pad - N)))  # (IN_PAD, n_pad)

    def w_spec(shape):
        return pl.BlockSpec(shape, lambda i: (0, 0))

    in_specs = [
        pl.BlockSpec((IN_PAD, tm), lambda i: (0, i)),     # xin
        w_spec((HPAD, IN_PAD)),  w_spec((HPAD, 1)),       # W1, b1
        w_spec((HPAD, HPAD)),    w_spec((HPAD, 1)),       # W2, b2 (bf16 W)
        w_spec((HPAD, HPAD)),    w_spec((HPAD, 1)),       # W3, b3 (bf16 W)
        w_spec((OUT_PAD, HPAD)), w_spec((OUT_PAD, 1)),    # W4, b4
    ]

    out_padded = pl.pallas_call(
        pinn_kernel,
        out_shape=jax.ShapeDtypeStruct((OUT_PAD, n_pad), jnp.float32),
        grid=(n_pad // tm,),
        in_specs=in_specs,
        out_specs=pl.BlockSpec((OUT_PAD, tm), lambda i: (0, i)),
        compiler_params=pltpu.CompilerParams(
            dimension_semantics=("parallel",)),   # megacore-shardable on v7x
    )(xin, *padded_params)

    return out_padded[0, :N].reshape(N, 1)                # (N, 1)


def pinn_reference(x, t, params):
    h = jnp.concatenate([x, t], axis=1)
    for W, b in params[:-1]:
        h = jnp.tanh(h @ W + b)
    W, b = params[-1]
    return h @ W + b


if __name__ == "__main__":
    key = jax.random.PRNGKey(0)
    kp, kx, kt = jax.random.split(key, 3)

    params = init_params(kp, LAYERS)
    padded = pad_params(params)       # hoisted: pad/transpose weights once

    # N deliberately not a multiple of TM: exercises the remainder/padding
    # path and yields a 2-step grid (so v7x shards across both TensorCores).
    N = 1000
    x = jax.random.uniform(kx, (N, 1), jnp.float32)   # spatial coords in [0, L)
    t = jax.random.uniform(kt, (N, 1), jnp.float32)   # time coords in [0, T)

    fwd = jax.jit(lambda x_, t_: pinn_forward(x_, t_, padded))
    out = jax.block_until_ready(fwd(x, t))

    ref = pinn_reference(x, t, params)
    assert out.shape == (N, 1)
    # Hidden matmuls run in bf16 (f32 accumulate), so agreement with the pure
    # f32 reference is ~1e-3 level rather than 1e-5.
    np.testing.assert_allclose(np.asarray(out), np.asarray(ref),
                               rtol=3e-2, atol=3e-2)
    print("KERNEL_OK")
</pallas_src>

<mosaic_0001>
module attributes {stable_mosaic.version = 11 : i64} {
  func.func @pinn_kernel(%arg0: i32, %arg1: memref<8x512xf32, #tpu.memory_space<vmem>>, %arg2: memref<64x8xf32, #tpu.memory_space<vmem>>, %arg3: memref<64x1xf32, #tpu.memory_space<vmem>>, %arg4: memref<64x64xbf16, #tpu.memory_space<vmem>>, %arg5: memref<64x1xf32, #tpu.memory_space<vmem>>, %arg6: memref<64x64xbf16, #tpu.memory_space<vmem>>, %arg7: memref<64x1xf32, #tpu.memory_space<vmem>>, %arg8: memref<8x64xf32, #tpu.memory_space<vmem>>, %arg9: memref<8x1xf32, #tpu.memory_space<vmem>>, %arg10: memref<8x512xf32, #tpu.memory_space<vmem>>) attributes {dimension_semantics = [#tpu.dimension_semantics<parallel>], iteration_bounds = array<i64: 2>, scalar_prefetch = 0 : i64, scratch_operands = 0 : i64, tpu.core_type = #tpu.core_type<tc>, window_params = [{transform_indices = @transform_0, window_bounds = array<i64: 8, 512>}, {pipeline_mode = #tpu.pipeline_mode<synchronous>, transform_indices = @transform_1, window_bounds = array<i64: 64, 8>}, {pipeline_mode = #tpu.pipeline_mode<synchronous>, transform_indices = @transform_2, window_bounds = array<i64: 64, 1>}, {pipeline_mode = #tpu.pipeline_mode<synchronous>, transform_indices = @transform_3, window_bounds = array<i64: 64, 64>}, {pipeline_mode = #tpu.pipeline_mode<synchronous>, transform_indices = @transform_4, window_bounds = array<i64: 64, 1>}, {pipeline_mode = #tpu.pipeline_mode<synchronous>, transform_indices = @transform_5, window_bounds = array<i64: 64, 64>}, {pipeline_mode = #tpu.pipeline_mode<synchronous>, transform_indices = @transform_6, window_bounds = array<i64: 64, 1>}, {pipeline_mode = #tpu.pipeline_mode<synchronous>, transform_indices = @transform_7, window_bounds = array<i64: 8, 64>}, {pipeline_mode = #tpu.pipeline_mode<synchronous>, transform_indices = @transform_8, window_bounds = array<i64: 8, 1>}, {transform_indices = @transform_9, window_bounds = array<i64: 8, 512>}]} {
    %c0 = arith.constant 0 : index
    %c0_0 = arith.constant 0 : index
    %0 = vector.load %arg1[%c0, %c0_0] : memref<8x512xf32, #tpu.memory_space<vmem>>, vector<8x512xf32>
    %1 = vector.extract_strided_slice %0 {offsets = [0, 0], sizes = [1, 512], strides = [1, 1]} : vector<8x512xf32> to vector<1x512xf32>
    %2 = vector.extract_strided_slice %0 {offsets = [1, 0], sizes = [1, 512], strides = [1, 1]} : vector<8x512xf32> to vector<1x512xf32>
    %c0_1 = arith.constant 0 : index
    %c0_2 = arith.constant 0 : index
    %3 = vector.load %arg2[%c0_1, %c0_2] : memref<64x8xf32, #tpu.memory_space<vmem>>, vector<64x8xf32>
    %4 = vector.extract_strided_slice %3 {offsets = [0, 0], sizes = [64, 1], strides = [1, 1]} : vector<64x8xf32> to vector<64x1xf32>
    %5 = vector.broadcast %4 : vector<64x1xf32> to vector<64x512xf32>
    %6 = vector.broadcast %1 : vector<1x512xf32> to vector<64x512xf32>
    %7 = arith.mulf %5, %6 : vector<64x512xf32>
    %8 = vector.extract_strided_slice %3 {offsets = [0, 1], sizes = [64, 1], strides = [1, 1]} : vector<64x8xf32> to vector<64x1xf32>
    %9 = vector.broadcast %8 : vector<64x1xf32> to vector<64x512xf32>
    %10 = vector.broadcast %2 : vector<1x512xf32> to vector<64x512xf32>
    %11 = arith.mulf %9, %10 : vector<64x512xf32>
    %12 = arith.addf %7, %11 : vector<64x512xf32>
    %c0_3 = arith.constant 0 : index
    %c0_4 = arith.constant 0 : index
    %13 = vector.load %arg3[%c0_3, %c0_4] : memref<64x1xf32, #tpu.memory_space<vmem>>, vector<64x1xf32>
    %14 = vector.broadcast %13 : vector<64x1xf32> to vector<64x512xf32>
    %15 = arith.addf %12, %14 : vector<64x512xf32>
    %16 = math.tanh %15 : vector<64x512xf32>
    %c0_5 = arith.constant 0 : index
    %c0_6 = arith.constant 0 : index
    %17 = vector.load %arg4[%c0_5, %c0_6] : memref<64x64xbf16, #tpu.memory_space<vmem>>, vector<64x64xbf16>
    %18 = arith.truncf %16 : vector<64x512xf32> to vector<64x512xbf16>
    %cst = arith.constant dense<0.000000e+00> : vector<64x512xf32>
    %19 = tpu.matmul %17, %18, %cst {dimension_numbers = #tpu.dot_dimension_numbers<[1], [0], [0], [1], [0, 0, 1, 1], [], []>} : vector<64x64xbf16>, vector<64x512xbf16>, vector<64x512xf32> -> vector<64x512xf32>
    %c0_7 = arith.constant 0 : index
    %c0_8 = arith.constant 0 : index
    %20 = vector.load %arg5[%c0_7, %c0_8] : memref<64x1xf32, #tpu.memory_space<vmem>>, vector<64x1xf32>
    %21 = vector.broadcast %20 : vector<64x1xf32> to vector<64x512xf32>
    %22 = arith.addf %19, %21 : vector<64x512xf32>
    %23 = math.tanh %22 : vector<64x512xf32>
    %c0_9 = arith.constant 0 : index
    %c0_10 = arith.constant 0 : index
    %24 = vector.load %arg6[%c0_9, %c0_10] : memref<64x64xbf16, #tpu.memory_space<vmem>>, vector<64x64xbf16>
    %25 = arith.truncf %23 : vector<64x512xf32> to vector<64x512xbf16>
    %cst_11 = arith.constant dense<0.000000e+00> : vector<64x512xf32>
    %26 = tpu.matmul %24, %25, %cst_11 {dimension_numbers = #tpu.dot_dimension_numbers<[1], [0], [0], [1], [0, 0, 1, 1], [], []>} : vector<64x64xbf16>, vector<64x512xbf16>, vector<64x512xf32> -> vector<64x512xf32>
    %c0_12 = arith.constant 0 : index
    %c0_13 = arith.constant 0 : index
    %27 = vector.load %arg7[%c0_12, %c0_13] : memref<64x1xf32, #tpu.memory_space<vmem>>, vector<64x1xf32>
    %28 = vector.broadcast %27 : vector<64x1xf32> to vector<64x512xf32>
    %29 = arith.addf %26, %28 : vector<64x512xf32>
    %30 = math.tanh %29 : vector<64x512xf32>
    %c0_14 = arith.constant 0 : index
    %c0_15 = arith.constant 0 : index
    %31 = vector.load %arg8[%c0_14, %c0_15] : memref<8x64xf32, #tpu.memory_space<vmem>>, vector<8x64xf32>
    %cst_16 = arith.constant dense<0.000000e+00> : vector<8x512xf32>
    %32 = tpu.matmul %31, %30, %cst_16 {dimension_numbers = #tpu.dot_dimension_numbers<[1], [0], [0], [1], [0, 0, 1, 1], [], []>} : vector<8x64xf32>, vector<64x512xf32>, vector<8x512xf32> -> vector<8x512xf32>
    %c0_17 = arith.constant 0 : index
    %c0_18 = arith.constant 0 : index
    %33 = vector.load %arg9[%c0_17, %c0_18] : memref<8x1xf32, #tpu.memory_space<vmem>>, vector<8x1xf32>
    %34 = vector.broadcast %33 : vector<8x1xf32> to vector<8x512xf32>
    %35 = arith.addf %32, %34 : vector<8x512xf32>
    %c0_19 = arith.constant 0 : index
    %c0_20 = arith.constant 0 : index
    %36 = vector.load %arg10[%c0_19, %c0_20] : memref<8x512xf32, #tpu.memory_space<vmem>>, vector<8x512xf32>
    tpu.vector_store %arg10[%c0_19, %c0_20], %35 {strides = array<i32>} : memref<8x512xf32, #tpu.memory_space<vmem>>, vector<8x512xf32>,
    return
  }
  func.func @transform_0(%arg0: i32) -> (i32, i32) {
    %c0_i32 = arith.constant 0 : i32
    %c0_i32_0 = arith.constant 0 : i32
    return %c0_i32, %arg0 : i32, i32
  }
  func.func @transform_1(%arg0: i32) -> (i32, i32) {
    %c0_i32 = arith.constant 0 : i32
    %c0_i32_0 = arith.constant 0 : i32
    %c0_i32_1 = arith.constant 0 : i32
    return %c0_i32, %c0_i32_0 : i32, i32
  }
  func.func @transform_2(%arg0: i32) -> (i32, i32) {
    %c0_i32 = arith.constant 0 : i32
    %c0_i32_0 = arith.constant 0 : i32
    %c0_i32_1 = arith.constant 0 : i32
    return %c0_i32, %c0_i32_0 : i32, i32
  }
  func.func @transform_3(%arg0: i32) -> (i32, i32) {
    %c0_i32 = arith.constant 0 : i32
    %c0_i32_0 = arith.constant 0 : i32
    %c0_i32_1 = arith.constant 0 : i32
    return %c0_i32, %c0_i32_0 : i32, i32
  }
  func.func @transform_4(%arg0: i32) -> (i32, i32) {
    %c0_i32 = arith.constant 0 : i32
    %c0_i32_0 = arith.constant 0 : i32
    %c0_i32_1 = arith.constant 0 : i32
    return %c0_i32, %c0_i32_0 : i32, i32
  }
  func.func @transform_5(%arg0: i32) -> (i32, i32) {
    %c0_i32 = arith.constant 0 : i32
    %c0_i32_0 = arith.constant 0 : i32
    %c0_i32_1 = arith.constant 0 : i32
    return %c0_i32, %c0_i32_0 : i32, i32
  }
  func.func @transform_6(%arg0: i32) -> (i32, i32) {
    %c0_i32 = arith.constant 0 : i32
    %c0_i32_0 = arith.constant 0 : i32
    %c0_i32_1 = arith.constant 0 : i32
    return %c0_i32, %c0_i32_0 : i32, i32
  }
  func.func @transform_7(%arg0: i32) -> (i32, i32) {
    %c0_i32 = arith.constant 0 : i32
    %c0_i32_0 = arith.constant 0 : i32
    %c0_i32_1 = arith.constant 0 : i32
    return %c0_i32, %c0_i32_0 : i32, i32
  }
  func.func @transform_8(%arg0: i32) -> (i32, i32) {
    %c0_i32 = arith.constant 0 : i32
    %c0_i32_0 = arith.constant 0 : i32
    %c0_i32_1 = arith.constant 0 : i32
    return %c0_i32, %c0_i32_0 : i32, i32
  }
  func.func @transform_9(%arg0: i32) -> (i32, i32) {
    %c0_i32 = arith.constant 0 : i32
    %c0_i32_0 = arith.constant 0 : i32
    return %c0_i32, %arg0 : i32, i32
  }
}

</mosaic_0001>

<bundles_post_ra>
// kernel: _lambda_.1
= control target key start
LH: loop header
LB: loop body
LE: loop exit
PB: predicated region body
PF: predicated region fallthrough
CT: control target
= control target key end

     0   :  { %14 = vsyncpa [#allocation3], 0  ;;  %s2532_s0 = inlined_call_operand.vmem [shape: f32[8,1024], index: 0, kind: input, shape index: {}]   ;;  %s2533_s1 = inlined_call_operand.hbm [shape: f32[64,8], index: 1, kind: input, shape index: {}]   ;;  %s2534_s2 = inlined_call_operand.hbm [shape: f32[64,1], index: 2, kind: input, shape index: {}]   ;;  %s2535_s3 = inlined_call_operand.hbm [shape: bf16[64,64], index: 3, kind: input, shape index: {}]   ;;  %s2536_s4 = inlined_call_operand.hbm [shape: f32[64,1], index: 4, kind: input, shape index: {}]   ;;  %s2537_s5 = inlined_call_operand.vmem [shape: bf16[64,64], index: 5, kind: input, shape index: {}]   ;;  %s2538_s6 = inlined_call_operand.vmem [shape: f32[64,1], index: 6, kind: input, shape index: {}]   ;;  %s2539_s7 = inlined_call_operand.vmem [shape: f32[8,64], index: 7, kind: input, shape index: {}]   ;;  %s2540_s8 = inlined_call_operand.vmem [shape: f32[8,1], index: 8, kind: input, shape index: {}]   ;;  %s2541_s9 = inlined_call_operand.vmem [shape: f32[8,1024], index: 9, kind: output, shape index: {}]  }
   0x1   :  { %15 = vsyncpa [#allocation5], 0 }
   0x2   :  { %16 = vsyncpa [#allocation8], 0  ;;  %s2034_s30 = smov 0  }
   0x3 LB: > { %s1538_s10 = sadd.s32 4294967295, %s1971_s30   ;;  %p1540_p0 = scmp.ge.s32.totalorder %s1971_s30, 1  ;;  %s1971_s30 = sphi %s2034_s30, %s22_s30  }
   0x4   : > { %p247_p1 = scmp.lt.s32.totalorder %s1971_s30, 3  ;;  %p2044_p2 = scmp.eq.s32.totalorder %s1538_s10, 0 }
   0x5   : > { %s1973_s13 = smov [#allocation4]   ;;  %s1974_s15 = smov [#allocation2]  }
   0x6   : > { %p2048_p3 = pnand %p1540_p0, %p247_p1  ;;  %s272_s14 = sshll.u32 %s1973_s13, 4  ;;  %s273_s14 = int_to_ptr.vmem [resolvable:$true] %s272_s14 }
   0x7   : > { %s259_s16 = sshll.u32 %s1974_s15, 4  ;;  %s1975_s18 = smov [#allocation6]   ;;  %s2054_s16 = int_to_ptr.vmem [resolvable:$true] %s259_s16 }
   0x8   : > { %p1599_p4 = pneg %p2048_p3  ;;  %s285_s19 = sshll.u32 %s1975_s18, 4  ;;  %s2062_s19 = int_to_ptr.vmem [resolvable:$true] %s285_s19 }
   0x9   : > { %s1860_s20 = scalar_lea.vmem %s273_s14, 1024  ;;  %p1868_p10 = scmp.lt.s32.totalorder %s273_s14, %s273_s14 }
   0xa   : > { %p2058_p5 = pnand %p2044_p2, %p1599_p4  ;;  %p1861_p7 = scmp.ne.s32.totalorder %s273_s14, %s1860_s20 }
   0xb   : > { %p1869_p11 = scmp.lt.s32.totalorder %s1860_s20, %s1860_s20 }
   0xc   : > { %p1851_p6 = pneg %p2058_p5 }
   0xd   : > { %p1870_p12 = por %p1869_p11, %p1868_p10 }
   0xe   : > { %p1863_p8 = pnand %p1861_p7, %p1851_p6 }
  0x10   : > { %p1864_p9 = pneg %p1863_p8 }
  0x12   : > { %p1871_p13 = pnand %p1870_p12, %p1864_p9 }
  0x14   : > { %1874 = shalt.err (!%p1871_p13)
}
  0x15   : > { %s1976_s21 = smov 128   ;;  %s1977_s22 = smov 8  }
  0x16   : > { %1605 = dma.hbm_to_vmem [thread:$0]  (!%p2058_p5), %s2534_s2, 1024, %s273_s14, [#allocation5], %s1976_s21, %s1976_s21, %s1977_s22  }
  0x17   : > { %s1886_s25 = scalar_lea.vmem %s2054_s16, 1024  ;;  %p1894_p7 = scmp.lt.s32.totalorder %s2054_s16, %s2054_s16 }
  0x18   : > { %p1887_p0 = scmp.ne.s32.totalorder %s2054_s16, %s1886_s25  ;;  %p1895_p8 = scmp.lt.s32.totalorder %s1886_s25, %s1886_s25 }
  0x1a   : > { %p1889_p1 = pnand %p1887_p0, %p1851_p6  ;;  %p1896_p9 = por %p1895_p8, %p1894_p7 }
  0x1c   : > { %p1890_p4 = pneg %p1889_p1 }
  0x1e   : > { %p1897_p10 = pnand %p1896_p9, %p1890_p4 }
  0x20   : > { %1900 = shalt.err (!%p1897_p10)
}
  0x21   : > { %1602 = dma.hbm_to_vmem [thread:$0]  (!%p2058_p5), %s2533_s1, 1024, %s2054_s16, [#allocation3], %s1976_s21, %s1976_s21, %s1977_s22  }
  0x22   : > { %s1912_s28 = scalar_lea.vmem %s2062_s19, 512  ;;  %p1920_p0 = scmp.lt.s32.totalorder %s2062_s19, %s2062_s19 }
  0x23   : > { %p1913_p11 = scmp.ne.s32.totalorder %s2062_s19, %s1912_s28  ;;  %p1921_p1 = scmp.lt.s32.totalorder %s1912_s28, %s1912_s28 }
  0x25   : > { %p1915_p12 = pnand %p1913_p11, %p1851_p6  ;;  %p1922_p4 = por %p1921_p1, %p1920_p0 }
  0x27   : > { %p1916_p13 = pneg %p1915_p12 }
  0x29   : > { %p1923_p7 = pnand %p1922_p4, %p1916_p13 }
  0x2b   : > { %1926 = shalt.err (!%p1923_p7)
}
  0x2c   : > { %s1978_s29 = smov 64   ;;  %s1979_s13 = smov 4  }
  0x2d   : > { %1608 = dma.hbm_to_vmem [thread:$0]  (!%p2058_p5), %s2535_s3, 512, %s2062_s19, [#allocation5], %s1978_s29, %s1978_s29, %s1979_s13  }
  0x2e   : > { %s1980_s16 = smov [#allocation7]  }
  0x2f   : > { %s298_s18 = sshll.u32 %s1980_s16, 4  ;;  %s299_s18 = int_to_ptr.vmem [resolvable:$true] %s298_s18 }
  0x30   : > { %s1938_s20 = scalar_lea.vmem %s299_s18, 1024  ;;  %p1946_p11 = scmp.lt.s32.totalorder %s299_s18, %s299_s18 }
  0x31   : > { %p1939_p8 = scmp.ne.s32.totalorder %s299_s18, %s1938_s20  ;;  %p1947_p12 = scmp.lt.s32.totalorder %s1938_s20, %s1938_s20 }
  0x33   : > { %p1941_p9 = pnand %p1939_p8, %p1851_p6  ;;  %p1948_p13 = por %p1947_p12, %p1946_p11 }
  0x35   : > { %p1942_p10 = pneg %p1941_p9 }
  0x37   : > { %p1949_p0 = pnand %p1948_p13, %p1942_p10 }
  0x39   : > { %1952 = shalt.err (!%p1949_p0)
}
  0x3a   : > { %1611 = dma.hbm_to_vmem [thread:$0]  (!%p2058_p5), %s2536_s4, 1024, %s299_s18, [#allocation8], %s1976_s21, %s1976_s21, %s1977_s22  }
  0x3b   : > { %335 = sbr.rel (%p2048_p3) target bundleno = 994 (0x3e2), region = 56 }
  0x40   : > { %1958 = dma.done.wait (%p2044_p2), [#allocation3], 1024  }
  0x41   : > { %1960 = vsyncadd (%p2044_p2), [#allocation3], 4294966272 }
  0x42   : > { %1962 = dma.done.wait (%p2044_p2), [#allocation5], 1536  }
  0x43   : > { %1964 = vsyncadd (%p2044_p2), [#allocation5], 4294965760 }
  0x44   : > { %1966 = dma.done.wait (%p2044_p2), [#allocation8], 1024  }
  0x45   : > { %1968 = vsyncadd (%p2044_p2), [#allocation8], 4294966272  ;;  %v1981_v0 = vmov 1   ;;  %v1982_v1 = vmov 0   ;;  %v406_v2 = vld [vmem:[#allocation2 + $0x30] sm:$0xff]  ;;  %v404_v3 = vld [vmem:[#allocation2 + $0x20] sm:$0xff]  ;;  %v448_v35 = vlaneseq }
  0x46   : > { %1641 = vset.pattern.permute.xlu0 %v1981_v0  ;;  %1639 = vset.pattern.permute.xlu1 %v1981_v0  ;;  %v407_v4 = vld [vmem:[#allocation2 + $0x38] sm:$0xff]  ;;  %v402_v5 = vld [vmem:[#allocation2 + $0x10] sm:$0xff]  ;;  %v400_v6 = vld [vmem:[#allocation2] sm:$0xff]  ;;  %s1551_s23 = sshll.u32 %s1538_s10, 2  ;;  %vm812_vm0 = vcmask 523264  }
  0x47   : > { %857 = vmatprep.mubr.bf16.mxu0 %v1982_v1  ;;  %930 = vmatprep.mubr.bf16.mxu1 %v1982_v1  ;;  %v405_v7 = vld [vmem:[#allocation2 + $0x28] sm:$0xff]  ;;  %v614_v8 = vld [vmem:[#allocation4 + $0x30] sm:$0xff]  ;;  %v615_v9 = vld [vmem:[#allocation4 + $0x38] sm:$0xff]  ;;  %p384_p2 = scmp.lt.s32.totalorder %s1551_s23, 7  ;;  %v449_v38 = vshrl.u32 %v448_v35, 7 }
  0x48   : > { %521 = vperm.xlu1 %1639, %v406_v2   ;;  %513 = vperm.xlu0 %1641, %v404_v3   ;;  %v403_v10 = vld [vmem:[#allocation2 + $0x18] sm:$0xff]  ;;  %v613_v11 = vld [vmem:[#allocation4 + $0x28] sm:$0xff]  ;;  %v612_v13 = vld [vmem:[#allocation4 + $0x20] sm:$0xff] }
  0x49   : > { %v611_v12 = vld [vmem:[#allocation4 + $0x18] sm:$0xff]  ;;  %v750_v14 = vld [vmem:[#allocation7 + $0x30] sm:$0xff]  ;;  %v748_v15 = vld [vmem:[#allocation7 + $0x20] sm:$0xff]  ;;  %s2546_s23 = smov (!%p384_p2, %s1551_s23), 7  ;;  %v530_v41 = vsub.s32 1, %v449_v38  ;;  %v450_v42 = vsub.s32 0, %v449_v38 }
  0x4a   : > { %v746_v16 = vld [vmem:[#allocation7 + $0x10] sm:$0xff]  ;;  %v401_v17 = vld [vmem:[#allocation2 + $0x8] sm:$0xff]  ;;  %v744_v18 = vld [vmem:[#allocation7] sm:$0xff]  ;;  %s1552_s11 = sshll.u32 %s2546_s23, 3 }
  0x4b   : > { %v1034_v19 = vld [vmem:[%s2538_s6 + $0x38] sm:$0xff]  ;;  %v610_v20 = vld [vmem:[#allocation4 + $0x10] sm:$0xff]  ;;  %v1032_v21 = vld [vmem:[%s2538_s6 + $0x28] sm:$0xff]  ;;  %s387_s21 = scalar_lea.vmem %s2532_s0, %s1552_s11  ;;  %s393_s18 = scalar_lea.vmem %s2541_s9, %s1552_s11 }
  0x4c   : > { %525 = vperm.xlu1 %1639, %v407_v4   ;;  %505 = vperm.xlu0 %1641, %v402_v5   ;;  %v608_v22 = vld [vmem:[#allocation4] sm:$0xff]  ;;  %v1030_v23 = vld [vmem:[%s2538_s6 + $0x18] sm:$0xff]  ;;  %v609_v24 = vld [vmem:[#allocation4 + $0x8] sm:$0xff] }
  0x4d   : > { %v1028_v25 = vld [vmem:[%s2538_s6 + $0x8] sm:$0xff]  ;;  %v751_v26 = vld [vmem:[#allocation7 + $0x38] sm:$0xff]  ;;  %v1286_v27 = vld [vmem:[%s2540_s8] sm:$0xff] }
  0x4e   : > { %v749_v28 = vld [vmem:[#allocation7 + $0x28] sm:$0xff]  ;;  %v747_v29 = vld [vmem:[#allocation7 + $0x18] sm:$0xff]  ;;  %v1033_v31 = vld [vmem:[%s2538_s6 + $0x30] sm:$0xff] }
  0x4f   : > { %v745_v30 = vld [vmem:[#allocation7 + $0x8] sm:$0xff]  ;;  %v1031_v32 = vld [vmem:[%s2538_s6 + $0x20] sm:$0xff]  ;;  %v1029_v33 = vld [vmem:[%s2538_s6 + $0x10] sm:$0xff] }
  0x50   : > { %1640 = vset.pattern.permute.xlu1 %v1982_v1  ;;  %497 = vperm.xlu0 %1641, %v400_v6   ;;  %v1027_v34 = vld [vmem:[%s2538_s6] sm:$0xff]  ;;  %v397_v46 = vld [vmem:[%s387_s21 + $0x8] sm:$0xff]  ;;  %v398_v47 = vld [vmem:[%s387_s21 + $0x10] sm:$0xff] }
  0x51   : > { %435 = vperm.xlu1 %1640, %v405_v7   ;;  %v396_v44 = vld [vmem:[%s387_s21] sm:$0xff]  ;;  %v399_v48 = vld [vmem:[%s387_s21 + $0x18] sm:$0xff]  ;;  %v2187_v51 = vrot.slane %v397_v46, %v530_v41  ;;  %v2189_v52 = vrot.slane %v398_v47, %v530_v41  ;;  %v2191_v53 = vrot.slane %v397_v46, %v450_v42  ;;  %v2193_v54 = vrot.slane %v398_v47, %v450_v42 }
  0x52   : > { %v2183_v49 = vrot.slane %v396_v44, %v530_v41  ;;  %v2185_v50 = vrot.slane %v396_v44, %v450_v42  ;;  %v2196_v58 = vrot.slane %v399_v48, %v530_v41  ;;  %v2198_v59 = vrot.slane %v399_v48, %v450_v42 }
  0x54   : > { %1646 = vset.pattern.permute.xlu0 %v1982_v1 }
  0x55   : > { %1642 = vset.pattern.permute.xlu1 %v1981_v0  ;;  %440 = vperm.xlu0 %1646, %v406_v2  }
  0x56   : > { %517 = vperm.xlu1 %1642, %v405_v7  }
  0x59   : > { %445 = vperm.xlu0 %1646, %v407_v4  }
  0x5a   : > { %1643 = vset.pattern.permute.xlu1 %v1982_v1 }
  0x5b   : > { %648 = vperm.xlu1 %1643, %v614_v8  }
  0x5d   : > { %430 = vperm.xlu0 %1646, %v404_v3  }
  0x5f   : > { %420 = vperm.xlu1 %1643, %v402_v5  }
  0x61   : > { %653 = vperm.xlu0 %1646, %v615_v9  }
  0x63   : > { %425 = vperm.xlu1 %1643, %v403_v10  }
  0x65   : > { %643 = vperm.xlu0 %1646, %v613_v11  }
  0x67   : > { %1644 = vset.pattern.permute.xlu1 %v1981_v0 }
  0x68   : > { %509 = vperm.xlu1 %1644, %v403_v10  }
  0x69   : > { %633 = vperm.xlu0 %1646, %v611_v12  }
  0x6c   : > { %1645 = vset.pattern.permute.xlu1 %v1982_v1 }
  0x6d   : > { %638 = vperm.xlu1 %1645, %v612_v13   ;;  %784 = vperm.xlu0 %1646, %v750_v14  }
  0x71   : > { %774 = vperm.xlu0 %1646, %v748_v15   ;;  %410 = vperm.xlu1 %1645, %v400_v6  }
  0x75   : > { %764 = vperm.xlu0 %1646, %v746_v16   ;;  %415 = vperm.xlu1 %1645, %v401_v17  }
  0x79   : > { %754 = vperm.xlu0 %1646, %v744_v18   ;;  %1647 = vset.pattern.permute.xlu1 %v1981_v0 }
  0x7a   : > { %501 = vperm.xlu1 %1647, %v401_v17  }
  0x7d   : > { %1072 = vperm.xlu0 %1646, %v1034_v19  }
  0x7e   : > { %1648 = vset.pattern.permute.xlu1 %v1982_v1 }
  0x7f   : > { %628 = vperm.xlu1 %1648, %v610_v20  }
  0x81   : > { %1062 = vperm.xlu0 %1646, %v1032_v21  }
  0x83   : > { %618 = vperm.xlu1 %1648, %v608_v22  }
  0x85   : > { %1052 = vperm.xlu0 %1646, %v1030_v23  }
  0x87   : > { %623 = vperm.xlu1 %1648, %v609_v24  }
  0x89   : > { %1042 = vperm.xlu0 %1646, %v1028_v25  }
  0x8b   : > { %789 = vperm.xlu1 %1648, %v751_v26  }
  0x8d   : > { %1289 = vperm.xlu0 %1646, %v1286_v27  }
  0x8f   : > { %779 = vperm.xlu1 %1648, %v749_v28  }
  0x93   : > { %769 = vperm.xlu1 %1648, %v747_v29  }
  0x97   : > { %759 = vperm.xlu1 %1648, %v745_v30  }
  0x9b   : > { %1067 = vperm.xlu1 %1648, %v1033_v31  }
  0x9f   : > { %1057 = vperm.xlu1 %1648, %v1031_v32  }
  0xa3   : > { %1047 = vperm.xlu1 %1648, %v1029_v33  }
  0xa7   : > { %1037 = vperm.xlu1 %1648, %v1027_v34  }
  0xc3   : > { %v522_v36 = vpop.permute.xlu1 %521  ;;  %v2169_v37 = vpop.permute.xlu0 %513 }
  0xc4   : > { %v568_v62 = vmul.f32 %v2183_v49, %v522_v36  ;;  %v569_v63 = vmul.f32 %v2187_v51, %v522_v36  ;;  %v570_v0 = vmul.f32 %v2189_v52, %v522_v36  ;;  %v571_v5 = vmul.f32 %v2196_v58, %v522_v36 }
  0xc5   : > { %v561_v41 = vmul.f32 %v2187_v51, %v2169_v37  ;;  %v562_v48 = vmul.f32 %v2189_v52, %v2169_v37 }
  0xc7   : > { %v526_v39 = vpop.permute.xlu1 %525  ;;  %v2172_v40 = vpop.permute.xlu0 %505 }
  0xc8   : > { %v572_v17 = vmul.f32 %v2183_v49, %v526_v39  ;;  %v573_v18 = vmul.f32 %v2187_v51, %v526_v39  ;;  %v574_v19 = vmul.f32 %v2189_v52, %v526_v39  ;;  %v575_v21 = vmul.f32 %v2196_v58, %v526_v39 }
  0xc9   : > { %v560_v39 = vmul.f32 %v2183_v49, %v2169_v37 }
  0xcb   : > { %v2179_v43 = vpop.permute.xlu0 %497 }
  0xcc   : > { %v2181_v45 = vpop.permute.xlu1 %435 }
  0xcd   : > { %v484_v36 = vmul.f32 %v2185_v50, %v2181_v45  ;;  %v485_v42 = vmul.f32 %v2191_v53, %v2181_v45 }
  0xd0   : > { %v441_v55 = vpop.permute.xlu0 %440 }
  0xd1   : > { %v488_v56 = vmul.f32 %v2185_v50, %v441_v55  ;;  %v518_v57 = vpop.permute.xlu1 %517  ;;  %v489_v60 = vmul.f32 %v2191_v53, %v441_v55  ;;  %v490_v61 = vmul.f32 %v2193_v54, %v441_v55  ;;  %v491_v2 = vmul.f32 %v2198_v59, %v441_v55 }
  0xd2   : > { %v564_v34 = vmul.f32 %v2183_v49, %v518_v57  ;;  %v565_v35 = vmul.f32 %v2187_v51, %v518_v57  ;;  %v566_v38 = vmul.f32 %v2189_v52, %v518_v57  ;;  %v567_v44 = vmul.f32 %v2196_v58, %v518_v57 }
  0xd3   : > { %v600_v4 = vadd.f32 %v568_v62, %v488_v56  ;;  %v601_v7 = vadd.f32 %v569_v63, %v489_v60  ;;  %v602_v8 = vadd.f32 %v570_v0, %v490_v61  ;;  %v603_v14 = vadd.f32 %v571_v5, %v491_v2 }
  0xd4   : > { %v446_v3 = vpop.permute.xlu0 %445  ;;  %v486_v55 = vmul.f32 %v2193_v54, %v2181_v45  ;;  %v596_v60 = vadd.f32 %v564_v34, %v484_v36  ;;  %v563_v61 = vmul.f32 %v2196_v58, %v2169_v37  ;;  %v487_v62 = vmul.f32 %v2198_v59, %v2181_v45 }
  0xd5   : > { %v492_v9 = vmul.f32 %v2185_v50, %v446_v3  ;;  %v493_v10 = vmul.f32 %v2191_v53, %v446_v3  ;;  %v494_v11 = vmul.f32 %v2193_v54, %v446_v3  ;;  %v495_v13 = vmul.f32 %v2198_v59, %v446_v3 }
  0xd6   : > { %v649_v6 = vpop.permute.xlu1 %648  ;;  %v597_v57 = vadd.f32 %v565_v35, %v485_v42  ;;  %v598_v3 = vadd.f32 %v566_v38, %v486_v55  ;;  %v599_v5 = vadd.f32 %v567_v44, %v487_v62  ;;  %v555_v62 = vmul.f32 %v2196_v58, %v2172_v40 }
  0xd7   : > { %v680_v12 = vadd.f32 %v649_v6, %v600_v4  ;;  %v681_v15 = vadd.f32 %v649_v6, %v601_v7  ;;  %v682_v20 = vadd.f32 %v649_v6, %v602_v8  ;;  %v683_v22 = vadd.f32 %v649_v6, %v603_v14 }
  0xd8   : > { %v431_v16 = vpop.permute.xlu0 %430  ;;  %v604_v24 = vadd.f32 %v572_v17, %v492_v9  ;;  %v605_v25 = vadd.f32 %v573_v18, %v493_v10  ;;  %v606_v26 = vadd.f32 %v574_v19, %v494_v11  ;;  %v607_v28 = vadd.f32 %v575_v21, %v495_v13 }
  0xd9   : > { %1657 = vtanh.f32 %v680_v12  ;;  %v480_v56 = vmul.f32 %v2185_v50, %v431_v16  ;;  %v481_v63 = vmul.f32 %v2191_v53, %v431_v16  ;;  %v482_v0 = vmul.f32 %v2193_v54, %v431_v16 }
  0xda   : > { %v2215_v23 = vpop.permute.xlu1 %420  ;;  %1659 = vtanh.f32 %v681_v15  ;;  %v483_v2 = vmul.f32 %v2198_v59, %v431_v16 }
  0xdb   : > { %1661 = vtanh.f32 %v682_v20  ;;  %v592_v10 = vadd.f32 %v560_v39, %v480_v56  ;;  %v593_v45 = vadd.f32 %v561_v41, %v481_v63  ;;  %v594_v14 = vadd.f32 %v562_v48, %v482_v0 }
  0xdc   : > { %v654_v27 = vpop.permute.xlu0 %653  ;;  %1663 = vtanh.f32 %v683_v22  ;;  %v595_v15 = vadd.f32 %v563_v61, %v483_v2  ;;  %v552_v56 = vmul.f32 %v2183_v49, %v2172_v40  ;;  %v472_v63 = vmul.f32 %v2185_v50, %v2215_v23 }
  0xdd   : > { %v684_v29 = vadd.f32 %v654_v27, %v604_v24  ;;  %v685_v30 = vadd.f32 %v654_v27, %v605_v25  ;;  %v686_v31 = vadd.f32 %v654_v27, %v606_v26  ;;  %v687_v32 = vadd.f32 %v654_v27, %v607_v28 }
  0xde   : > { %v2217_v33 = vpop.permute.xlu1 %425  ;;  %v474_v2 = vmul.f32 %v2193_v54, %v2215_v23 }
  0xdf   : > { %1665 = vtanh.f32 %v684_v29  ;;  %v476_v16 = vmul.f32 %v2185_v50, %v2217_v33  ;;  %v477_v22 = vmul.f32 %v2191_v53, %v2217_v33  ;;  %v479_v38 = vmul.f32 %v2198_v59, %v2217_v33 }
  0xe0   : > { %1667 = vtanh.f32 %v685_v30  ;;  %v644_v46 = vpop.permute.xlu0 %643 }
  0xe1   : > { %1669 = vtanh.f32 %v686_v31  ;;  %v676_v4 = vadd.f32 %v644_v46, %v596_v60  ;;  %v677_v6 = vadd.f32 %v644_v46, %v597_v57  ;;  %v678_v8 = vadd.f32 %v644_v46, %v598_v3 }
  0xe2   : > { %1671 = vtanh.f32 %v687_v32  ;;  %v679_v37 = vadd.f32 %v644_v46, %v599_v5  ;;  %v478_v32 = vmul.f32 %v2193_v54, %v2217_v33  ;;  %v553_v33 = vmul.f32 %v2187_v51, %v2172_v40 }
  0xe3   : > { %v510_v47 = vpop.permute.xlu1 %509  ;;  %1673 = vtanh.f32 %v676_v4  ;;  %v554_v60 = vmul.f32 %v2189_v52, %v2172_v40  ;;  %v473_v57 = vmul.f32 %v2191_v53, %v2215_v23  ;;  %v475_v3 = vmul.f32 %v2198_v59, %v2215_v23 }
  0xe4   : > { %v556_v12 = vmul.f32 %v2183_v49, %v510_v47  ;;  %1675 = vtanh.f32 %v677_v6  ;;  %v557_v19 = vmul.f32 %v2187_v51, %v510_v47  ;;  %v558_v24 = vmul.f32 %v2189_v52, %v510_v47  ;;  %v634_v42 = vpop.permute.xlu0 %633 }
  0xe5   : > { %1677 = vtanh.f32 %v678_v8  ;;  %v559_v28 = vmul.f32 %v2196_v58, %v510_v47 }
  0xe6   : > { %v1658_v7 = vpop.eup %1657  ;;  %1679 = vtanh.f32 %v679_v37  ;;  %v588_v29 = vadd.f32 %v556_v12, %v476_v16  ;;  %v589_v39 = vadd.f32 %v557_v19, %v477_v22  ;;  %v590_v44 = vadd.f32 %v558_v24, %v478_v32 }
  0xe7   : > { %v1660_v11 = vpop.eup %1659  ;;  %v591_v48 = vadd.f32 %v559_v28, %v479_v38  ;;  %v546_v37 = vmul.f32 %v2189_v52, %v2179_v43  ;;  %v547_v12 = vmul.f32 %v2196_v58, %v2179_v43 }
  0xe8   : > { %v639_v9 = vpop.permute.xlu1 %638  ;;  %v1662_v13 = vpop.eup %1661  ;;  %v668_v55 = vadd.f32 %v634_v42, %v588_v29  ;;  %v669_v61 = vadd.f32 %v634_v42, %v589_v39  ;;  %v670_v0 = vadd.f32 %v634_v42, %v590_v44 }
  0xe9   : > { %v672_v17 = vadd.f32 %v639_v9, %v592_v10  ;;  %v1664_v18 = vpop.eup %1663  ;;  %v673_v20 = vadd.f32 %v639_v9, %v593_v45  ;;  %v674_v25 = vadd.f32 %v639_v9, %v594_v14  ;;  %v675_v30 = vadd.f32 %v639_v9, %v595_v15 }
  0xea   : > { %v671_v4 = vadd.f32 %v634_v42, %v591_v48  ;;  %v544_v10 = vmul.f32 %v2183_v49, %v2179_v43  ;;  %v584_v45 = vadd.f32 %v552_v56, %v472_v63  ;;  %v585_v14 = vadd.f32 %v553_v33, %v473_v57 }
  0xeb   : > { %1681 = vtanh.f32 %v672_v17  ;;  %v586_v15 = vadd.f32 %v554_v60, %v474_v2  ;;  %v587_v17 = vadd.f32 %v555_v62, %v475_v3 }
  0xec   : > { %v1666_v21 = vpop.eup %1665  ;;  %v411_v26 = vpop.permute.xlu1 %410  ;;  %1683 = vtanh.f32 %v673_v20 }
  0xed   : > { %v1668_v27 = vpop.eup %1667  ;;  %v740_v35 = vpack.c.bf16 %v1666_v21, %v1658_v7  ;;  %1685 = vtanh.f32 %v674_v25  ;;  %v464_v6 = vmul.f32 %v2185_v50, %v411_v26  ;;  %v465_v40 = vmul.f32 %v2191_v53, %v411_v26 }
  0xee   : > { %v1670_v31 = vpop.eup %1669  ;;  %v741_v34 = vpack.c.bf16 %v1668_v27, %v1660_v11  ;;  %1687 = vtanh.f32 %v675_v30  ;;  %v466_v7 = vmul.f32 %v2193_v54, %v411_v26  ;;  %v467_v8 = vmul.f32 %v2198_v59, %v411_v26 }
  0xef   : > { %v1672_v36 = vpop.eup %1671  ;;  %v742_v41 = vpack.c.bf16 %v1670_v31, %v1662_v13  ;;  %1689 = vtanh.f32 %v668_v55  ;;  %v545_v11 = vmul.f32 %v2187_v51, %v2179_v43  ;;  %v576_v19 = vadd.f32 %v544_v10, %v464_v6 }
  0xf0   : > { %833 = vmatprep.subr.bf16.mxu0 %v741_v34  ;;  %v743_v46 = vpack.c.bf16 %v1672_v36, %v1664_v18  ;;  %v2255_v47 = vpop.permute.xlu1 %415  ;;  %v1674_v9 = vpop.eup %1673  ;;  %1691 = vtanh.f32 %v669_v61  ;;  %v578_v21 = vadd.f32 %v546_v37, %v466_v7  ;;  %v579_v22 = vadd.f32 %v547_v12, %v467_v8 }
  0xf1   : > { %834 = vmatpush1.bf16.msra.mxu0 %v740_v35  ;;  %v1676_v23 = vpop.eup %1675  ;;  %1693 = vtanh.f32 %v670_v0  ;;  %v577_v20 = vadd.f32 %v545_v11, %v465_v40  ;;  %v468_v25 = vmul.f32 %v2185_v50, %v2255_v47  ;;  %v469_v29 = vmul.f32 %v2191_v53, %v2255_v47 }
  0xf2   : > { %906 = vmatprep.subr.bf16.mxu1 %v743_v46  ;;  %v1678_v13 = vpop.eup %1677  ;;  %1695 = vtanh.f32 %v671_v4  ;;  %v470_v50 = vmul.f32 %v2193_v54, %v2255_v47 }
  0xf3   : > { %907 = vmatpush1.bf16.msra.mxu1 %v742_v41  ;;  %v1680_v18 = vpop.eup %1679 }
  0xf5   : > { %v502_v5 = vpop.permute.xlu1 %501 }
  0xf6   : > { %v548_v30 = vmul.f32 %v2183_v49, %v502_v5  ;;  %v549_v35 = vmul.f32 %v2187_v51, %v502_v5  ;;  %v550_v36 = vmul.f32 %v2189_v52, %v502_v5  ;;  %v551_v41 = vmul.f32 %v2196_v58, %v502_v5 }
  0xf7   : > { %v471_v51 = vmul.f32 %v2198_v59, %v2255_v47 }
  0xf8   : > { %v1682_v24 = vpop.eup %1681  ;;  %v580_v54 = vadd.f32 %v548_v30, %v468_v25  ;;  %v581_v55 = vadd.f32 %v549_v35, %v469_v29  ;;  %v582_v58 = vadd.f32 %v550_v36, %v470_v50 }
  0xf9   : > { %v1684_v28 = vpop.eup %1683  ;;  %v736_v32 = vpack.c.bf16 %v1674_v9, %v1682_v24  ;;  %v583_v60 = vadd.f32 %v551_v41, %v471_v51 }
  0xfa   : > { %v629_v16 = vpop.permute.xlu1 %628  ;;  %v1686_v34 = vpop.eup %1685  ;;  %v737_v38 = vpack.c.bf16 %v1676_v23, %v1684_v28 }
  0xfb   : > { %v664_v26 = vadd.f32 %v629_v16, %v584_v45  ;;  %v665_v27 = vadd.f32 %v629_v16, %v585_v14  ;;  %v666_v43 = vadd.f32 %v629_v16, %v586_v15  ;;  %v667_v31 = vadd.f32 %v629_v16, %v587_v17  ;;  %v1688_v39 = vpop.eup %1687  ;;  %v1649_v16 = vld [vmem:[#allocation6] sm:$0xff]  }
  0xfc   : > { %v738_v42 = vpack.c.bf16 %v1678_v13, %v1686_v34  ;;  %835 = vmatprep.subr.bf16.mxu0 %v737_v38  ;;  %v739_v49 = vpack.c.bf16 %v1680_v18, %v1688_v39  ;;  %v1690_v56 = vpop.eup %1689 }
  0xfd   : > { %1697 = vtanh.f32 %v664_v26  ;;  %836 = vmatpush1.bf16.msra.mxu0 %v736_v32  ;;  %v1692_v57 = vpop.eup %1691 }
  0xfe   : > { %1699 = vtanh.f32 %v665_v27  ;;  %v619_v53 = vpop.permute.xlu1 %618  ;;  %908 = vmatprep.subr.bf16.mxu1 %v739_v49  ;;  %v1694_v47 = vpop.eup %1693 }
  0xff   : > { %1701 = vtanh.f32 %v666_v43  ;;  %v656_v44 = vadd.f32 %v619_v53, %v576_v19  ;;  %v657_v46 = vadd.f32 %v619_v53, %v577_v20  ;;  %v658_v52 = vadd.f32 %v619_v53, %v578_v21  ;;  %909 = vmatpush1.bf16.msra.mxu1 %v738_v42  ;;  %v1696_v0 = vpop.eup %1695  ;;  %v1650_v19 = vld [vmem:[#allocation6 + $0x8] sm:$0xff]   ;;  %v1651_v20 = vld [vmem:[#allocation6 + $0x10] sm:$0xff]   ;;  %v1652_v21 = vld [vmem:[#allocation6 + $0x18] sm:$0xff]  }
 0x100   : > { %1703 = vtanh.f32 %v667_v31  ;;  %v659_v48 = vadd.f32 %v619_v53, %v579_v22  ;;  %v2313_v22 = vpop.permute.xlu0 %784 }
 0x101   : > { %1705 = vtanh.f32 %v656_v44 }
 0x102   : > { %1707 = vtanh.f32 %v657_v46  ;;  %v624_v33 = vpop.permute.xlu1 %623 }
 0x103   : > { %1709 = vtanh.f32 %v658_v52  ;;  %v660_v61 = vadd.f32 %v624_v33, %v580_v54  ;;  %v661_v62 = vadd.f32 %v624_v33, %v581_v55  ;;  %v662_v63 = vadd.f32 %v624_v33, %v582_v58 }
 0x104   : > { %1711 = vtanh.f32 %v659_v48  ;;  %v663_v59 = vadd.f32 %v624_v33, %v583_v60  ;;  %v2317_v25 = vpop.permute.xlu0 %774 }
 0x105   : > { %1713 = vtanh.f32 %v660_v61 }
 0x106   : > { %1715 = vtanh.f32 %v661_v62  ;;  %v2315_v24 = vpop.permute.xlu1 %789 }
 0x107   : > { %1717 = vtanh.f32 %v662_v63 }
 0x108   : > { %1719 = vtanh.f32 %v663_v59  ;;  %v2327_v31 = vpop.permute.xlu0 %764 }
 0x10a   : > { %v1698_v2 = vpop.eup %1697  ;;  %v2321_v27 = vpop.permute.xlu1 %779 }
 0x10b   : > { %v1700_v3 = vpop.eup %1699  ;;  %v732_v4 = vpack.c.bf16 %v1690_v56, %v1698_v2 }
 0x10c   : > { %v1702_v5 = vpop.eup %1701  ;;  %v733_v6 = vpack.c.bf16 %v1692_v57, %v1700_v3  ;;  %v2337_v41 = vpop.permute.xlu0 %754 }
 0x10d   : > { %v1704_v40 = vpop.eup %1703  ;;  %v734_v7 = vpack.c.bf16 %v1694_v47, %v1702_v5 }
 0x10e   : > { %v1706_v8 = vpop.eup %1705  ;;  %837 = vmatprep.subr.bf16.mxu0 %v733_v6  ;;  %v735_v9 = vpack.c.bf16 %v1696_v0, %v1704_v40  ;;  %v2331_v35 = vpop.permute.xlu1 %769 }
 0x10f   : > { %v1708_v10 = vpop.eup %1707  ;;  %838 = vmatpush1.bf16.msra.mxu0 %v732_v4 }
 0x110   : > { %v1710_v11 = vpop.eup %1709  ;;  %910 = vmatprep.subr.bf16.mxu1 %v735_v9 }
 0x111   : > { %v1712_v23 = vpop.eup %1711  ;;  %911 = vmatpush1.bf16.msra.mxu1 %v734_v7 }
 0x112   : > { %v1714_v37 = vpop.eup %1713  ;;  %v2341_v49 = vpop.permute.xlu1 %759 }
 0x113   : > { %v1716_v12 = vpop.eup %1715  ;;  %v728_v45 = vpack.c.bf16 %v1714_v37, %v1706_v8 }
 0x114   : > { %v1718_v13 = vpop.eup %1717  ;;  %v729_v14 = vpack.c.bf16 %v1716_v12, %v1708_v10 }
 0x115   : > { %v1720_v15 = vpop.eup %1719  ;;  %v730_v17 = vpack.c.bf16 %v1718_v13, %v1710_v11 }
 0x116   : > { %839 = vmatprep.subr.bf16.mxu0 %v729_v14  ;;  %v731_v18 = vpack.c.bf16 %v1720_v15, %v1712_v23 }
 0x117   : > { %840 = vmatpush1.bf16.msra.mxu0 %v728_v45 }
 0x118   : > { %912 = vmatprep.subr.bf16.mxu1 %v731_v18 }
 0x119   : > { %913 = vmatpush1.bf16.msra.mxu1 %v730_v17 }
 0x11a   : > { %1559 = vmatmul.mubr.msk.bf16.vlgmr.msra.gmra.mxu0 %vm812_vm0, %v1649_v16 }
 0x11b   : > { %867 = vmatprep.mubr.bf16.mxu0 %v1982_v1 }
 0x11c   : > { %1563 = vmatmul.mubr.msk.bf16.vlgmr.msra.gmra.mxu1 %vm812_vm0, %v1649_v16 }
 0x11d   : > { %940 = vmatprep.mubr.bf16.mxu1 %v1982_v1 }
 0x122   : > { %1560 = vmatmul.mubr.msk.bf16.gmra.mxu0 %vm812_vm0, %v1650_v19 }
 0x123   : > { %877 = vmatprep.mubr.bf16.mxu0 %v1982_v1 }
 0x124   : > { %1564 = vmatmul.mubr.msk.bf16.gmra.mxu1 %vm812_vm0, %v1650_v19 }
 0x125   : > { %950 = vmatprep.mubr.bf16.mxu1 %v1982_v1 }
 0x12a   : > { %1561 = vmatmul.mubr.msk.bf16.gmra.mxu0 %vm812_vm0, %v1651_v20 }
 0x12b   : > { %887 = vmatprep.mubr.bf16.mxu0 %v1982_v1 }
 0x12c   : > { %1565 = vmatmul.mubr.msk.bf16.gmra.mxu1 %vm812_vm0, %v1651_v20 }
 0x12d   : > { %960 = vmatprep.mubr.bf16.mxu1 %v1982_v1 }
 0x132   : > { %1562 = vmatmul.mubr.msk.bf16.gmra.mxu0 %vm812_vm0, %v1652_v21 }
 0x133   : > { %1139 = vmatprep.mubr.bf16.mxu0 %v1982_v1 }
 0x134   : > { %1566 = vmatmul.mubr.msk.bf16.gmra.mxu1 %vm812_vm0, %v1652_v21 }
 0x135   : > { %1212 = vmatprep.mubr.bf16.mxu1 %v1982_v1 }
 0x1da   : > { %v2319_v26 = vpop.f32.mrf.mxu0 }
 0x1dc   : > { %v2323_v43 = vpop.f32.mrf.mxu1  ;;  %v861_v28 = vpop.f32.mrf.mxu0 }
 0x1dd   : > { %v862_v44 = vadd.f32 %v861_v28, %v2337_v41 }
 0x1de   : > { %v934_v29 = vpop.f32.mrf.mxu1  ;;  %v2325_v30 = vpop.f32.mrf.mxu0 }
 0x1df   : > { %v935_v46 = vadd.f32 %v934_v29, %v2337_v41  ;;  %1721 = vtanh.f32 %v862_v44 }
 0x1e0   : > { %v2329_v32 = vpop.f32.mrf.mxu1  ;;  %v865_v34 = vpop.f32.mrf.mxu0 }
 0x1e1   : > { %v866_v48 = vadd.f32 %v865_v34, %v2341_v49  ;;  %1723 = vtanh.f32 %v935_v46 }
 0x1e2   : > { %v938_v36 = vpop.f32.mrf.mxu1  ;;  %v2333_v38 = vpop.f32.mrf.mxu0 }
 0x1e3   : > { %v939_v54 = vadd.f32 %v938_v36, %v2341_v49  ;;  %1725 = vtanh.f32 %v866_v48 }
 0x1e4   : > { %v2335_v39 = vpop.f32.mrf.mxu1  ;;  %v871_v50 = vpop.f32.mrf.mxu0 }
 0x1e5   : > { %v872_v56 = vadd.f32 %v871_v50, %v2327_v31  ;;  %1727 = vtanh.f32 %v939_v54  ;;  %v870_v54 = vadd.f32 %v2333_v38, %v2327_v31  ;;  %v860_v38 = vadd.f32 %v2319_v26, %v2337_v41 }
 0x1e6   : > { %v944_v42 = vpop.f32.mrf.mxu1  ;;  %v2339_v53 = vpop.f32.mrf.mxu0 }
 0x1e7   : > { %v945_v33 = vadd.f32 %v944_v42, %v2327_v31  ;;  %1729 = vtanh.f32 %v872_v56 }
 0x1e8   : > { %v2345_v51 = vpop.f32.mrf.mxu1  ;;  %v875_v52 = vpop.f32.mrf.mxu0 }
 0x1e9   : > { %v876_v62 = vadd.f32 %v875_v52, %v2331_v35  ;;  %1731 = vtanh.f32 %v945_v33  ;;  %v874_v52 = vadd.f32 %v2339_v53, %v2331_v35  ;;  %v947_v48 = vadd.f32 %v2345_v51, %v2331_v35 }
 0x1ea   : > { %v948_v55 = vpop.f32.mrf.mxu1  ;;  %v879_v58 = vpop.f32.mrf.mxu0  ;;  %v864_v53 = vadd.f32 %v2325_v30, %v2341_v49 }
 0x1eb   : > { %v949_v63 = vadd.f32 %v948_v55, %v2331_v35  ;;  %1733 = vtanh.f32 %v876_v62  ;;  %v880_v42 = vadd.f32 %v879_v58, %v2317_v25  ;;  %v937_v35 = vadd.f32 %v2329_v32, %v2341_v49 }
 0x1ec   : > { %v952_v60 = vpop.f32.mrf.mxu1  ;;  %v881_v61 = vpop.f32.mrf.mxu0 }
 0x1ed   : > { %v882_v47 = vadd.f32 %v881_v61, %v2317_v25  ;;  %1735 = vtanh.f32 %v949_v63  ;;  %v2361_v45 = vpop.eup %1721  ;;  %v953_v44 = vadd.f32 %v952_v60, %v2317_v25 }
 0x1ee   : > { %v954_v57 = vpop.f32.mrf.mxu1  ;;  %v883_v59 = vpop.f32.mrf.mxu0 }
 0x1ef   : > { %v955_v0 = vadd.f32 %v954_v57, %v2317_v25  ;;  %1737 = vtanh.f32 %v882_v47  ;;  %v2363_v15 = vpop.eup %1723  ;;  %v884_v28 = vadd.f32 %v883_v59, %v2321_v27  ;;  %v943_v25 = vadd.f32 %v2335_v39, %v2327_v31 }
 0x1f0   : > { %v956_v2 = vpop.f32.mrf.mxu1  ;;  %v885_v3 = vpop.f32.mrf.mxu0  ;;  %v933_v31 = vadd.f32 %v2323_v43, %v2337_v41 }
 0x1f1   : > { %v886_v4 = vadd.f32 %v885_v3, %v2321_v27  ;;  %1739 = vtanh.f32 %v955_v0  ;;  %v2367_v16 = vpop.eup %1725  ;;  %v957_v36 = vadd.f32 %v956_v2, %v2321_v27 }
 0x1f2   : > { %v958_v5 = vpop.f32.mrf.mxu1  ;;  %v889_v6 = vpop.f32.mrf.mxu0 }
 0x1f3   : > { %v959_v40 = vadd.f32 %v958_v5, %v2321_v27  ;;  %v890_v7 = vadd.f32 %v889_v6, %v2313_v22  ;;  %1741 = vtanh.f32 %v886_v4  ;;  %v2370_v21 = vpop.eup %1727 }
 0x1f4   : > { %v962_v8 = vpop.f32.mrf.mxu1  ;;  %v891_v9 = vpop.f32.mrf.mxu0 }
 0x1f5   : > { %v892_v10 = vadd.f32 %v891_v9, %v2313_v22  ;;  %1743 = vtanh.f32 %v959_v40  ;;  %v963_v19 = vadd.f32 %v962_v8, %v2313_v22  ;;  %v2374_v34 = vpop.eup %1729 }
 0x1f6   : > { %v964_v11 = vpop.f32.mrf.mxu1  ;;  %v893_v23 = vpop.f32.mrf.mxu0  ;;  %1745 = vtanh.f32 %v890_v7 }
 0x1f7   : > { %v965_v37 = vadd.f32 %v964_v11, %v2313_v22  ;;  %v894_v12 = vadd.f32 %v893_v23, %v2315_v24  ;;  %1747 = vtanh.f32 %v892_v10  ;;  %v2377_v50 = vpop.eup %1731  ;;  %v1012_v23 = vpack.c.bf16 %v2367_v16, %v2361_v45  ;;  %v1654_v45 = vld [vmem:[%s2537_s5 + $0x8] sm:$0xff]   ;;  %v1656_v16 = vld [vmem:[%s2537_s5 + $0x18] sm:$0xff]  }
 0x1f8   : > { %v966_v13 = vpop.f32.mrf.mxu1  ;;  %v895_v14 = vpop.f32.mrf.mxu0 }
 0x1f9   : > { %1749 = vtanh.f32 %v965_v37  ;;  %v967_v17 = vadd.f32 %v966_v13, %v2315_v24  ;;  %v896_v18 = vadd.f32 %v895_v14, %v2315_v24  ;;  %v1734_v22 = vpop.eup %1733 }
 0x1fa   : > { %1751 = vtanh.f32 %v894_v12  ;;  %v968_v20 = vpop.f32.mrf.mxu1  ;;  %v1736_v46 = vpop.eup %1735  ;;  %v1016_v5 = vpack.c.bf16 %v1734_v22, %v2374_v34  ;;  %v1014_v12 = vpack.c.bf16 %v2370_v21, %v2363_v15  ;;  %v1655_v15 = vld [vmem:[%s2537_s5 + $0x10] sm:$0xff]  }
 0x1fb   : > { %1753 = vtanh.f32 %v967_v17  ;;  %v969_v29 = vadd.f32 %v968_v20, %v2315_v24  ;;  %v1018_v40 = vpack.c.bf16 %v1736_v46, %v2377_v50  ;;  %v1983_v20 = vmov 0.0   ;;  %v2429_v21 = vpop.permute.xlu1 %1067 }
 0x1fc   : > { %1755 = vtanh.f32 %v896_v18  ;;  %v1738_v24 = vpop.eup %1737 }
 0x1fd   : > { %1757 = vtanh.f32 %v969_v29 }
 0x1fe   : > { %1759 = vtanh.f32 %v963_v19  ;;  %v1740_v27 = vpop.eup %1739  ;;  %v1653_v19 = vld [vmem:[%s2537_s5] sm:$0xff]  }
 0x1ff   : > { %1761 = vtanh.f32 %v884_v28  ;;  %v2431_v28 = vpop.permute.xlu0 %1072  ;;  %v2433_v34 = vpop.permute.xlu1 %1057 }
 0x200   : > { %1763 = vtanh.f32 %v957_v36  ;;  %v1742_v55 = vpop.eup %1741 }
 0x201   : > { %1765 = vtanh.f32 %v880_v42  ;;  %v1020_v59 = vpack.c.bf16 %v1742_v55, %v1738_v24 }
 0x202   : > { %1767 = vtanh.f32 %v953_v44  ;;  %v1744_v58 = vpop.eup %1743 }
 0x203   : > { %1769 = vtanh.f32 %v874_v52  ;;  %v1746_v56 = vpop.eup %1745  ;;  %v1022_v43 = vpack.c.bf16 %v1744_v58, %v1740_v27  ;;  %v2437_v50 = vpop.permute.xlu0 %1062 }
 0x204   : > { %1771 = vtanh.f32 %v947_v48  ;;  %v1748_v51 = vpop.eup %1747  ;;  %v2443_v52 = vpop.permute.xlu1 %1047 }
 0x205   : > { %1773 = vtanh.f32 %v870_v54 }
 0x206   : > { %v1750_v33 = vpop.eup %1749  ;;  %1775 = vtanh.f32 %v943_v25 }
 0x207   : > { %v1752_v39 = vpop.eup %1751  ;;  %1777 = vtanh.f32 %v864_v53  ;;  %v2447_v27 = vpop.permute.xlu0 %1052 }
 0x208   : > { %v1754_v60 = vpop.eup %1753  ;;  %1779 = vtanh.f32 %v937_v35  ;;  %v1023_v63 = vpack.c.bf16 %v1752_v39, %v1746_v56  ;;  %v2453_v53 = vpop.permute.xlu1 %1037 }
 0x209   : > { %v1756_v30 = vpop.eup %1755  ;;  %1781 = vtanh.f32 %v860_v38 }
 0x20a   : > { %v1758_v61 = vpop.eup %1757  ;;  %1783 = vtanh.f32 %v933_v31  ;;  %v1024_v32 = vpack.c.bf16 %v1756_v30, %v1748_v51 }
 0x20b   : > { %v1760_v49 = vpop.eup %1759  ;;  %v1026_v62 = vpack.c.bf16 %v1758_v61, %v1750_v33  ;;  %v2458_v38 = vpop.permute.xlu0 %1042 }
 0x20c   : > { %v1762_v57 = vpop.eup %1761  ;;  %1115 = vmatprep.subr.bf16.mxu0 %v1024_v32  ;;  %v1025_v26 = vpack.c.bf16 %v1754_v60, %v1760_v49 }
 0x20d   : > { %v1764_v47 = vpop.eup %1763  ;;  %1188 = vmatprep.subr.bf16.mxu1 %v1026_v62  ;;  %1116 = vmatpush1.bf16.msra.mxu0 %v1023_v63 }
 0x20e   : > { %v1766_v41 = vpop.eup %1765  ;;  %1189 = vmatpush1.bf16.msra.mxu1 %v1025_v26  ;;  %1117 = vmatprep.subr.bf16.mxu0 %v1020_v59 }
 0x20f   : > { %v1768_v0 = vpop.eup %1767  ;;  %1190 = vmatprep.subr.bf16.mxu1 %v1022_v43  ;;  %v1019_v2 = vpack.c.bf16 %v1762_v57, %v1766_v41 }
 0x210   : > { %v1770_v3 = vpop.eup %1769  ;;  %v1021_v4 = vpack.c.bf16 %v1764_v47, %v1768_v0 }
 0x211   : > { %v1772_v6 = vpop.eup %1771  ;;  %1118 = vmatpush1.bf16.msra.mxu0 %v1019_v2 }
 0x212   : > { %v1774_v7 = vpop.eup %1773  ;;  %1191 = vmatpush1.bf16.msra.mxu1 %v1021_v4  ;;  %1119 = vmatprep.subr.bf16.mxu0 %v1016_v5 }
 0x213   : > { %v1776_v8 = vpop.eup %1775  ;;  %1192 = vmatprep.subr.bf16.mxu1 %v1018_v40  ;;  %v1015_v9 = vpack.c.bf16 %v1770_v3, %v1774_v7 }
 0x214   : > { %v1778_v10 = vpop.eup %1777  ;;  %v1017_v11 = vpack.c.bf16 %v1772_v6, %v1776_v8 }
 0x215   : > { %v1780_v37 = vpop.eup %1779  ;;  %1120 = vmatpush1.bf16.msra.mxu0 %v1015_v9 }
 0x216   : > { %v1782_v13 = vpop.eup %1781  ;;  %1193 = vmatpush1.bf16.msra.mxu1 %v1017_v11  ;;  %1121 = vmatprep.subr.bf16.mxu0 %v1012_v23 }
 0x217   : > { %v1784_v14 = vpop.eup %1783  ;;  %1194 = vmatprep.subr.bf16.mxu1 %v1014_v12  ;;  %v1011_v17 = vpack.c.bf16 %v1778_v10, %v1782_v13 }
 0x218   : > { %v1013_v18 = vpack.c.bf16 %v1780_v37, %v1784_v14 }
 0x219   : > { %1122 = vmatpush1.bf16.msra.mxu0 %v1011_v17 }
 0x21a   : > { %1195 = vmatpush1.bf16.msra.mxu1 %v1013_v18 }
 0x21c   : > { %1571 = vmatmul.mubr.msk.bf16.vlgmr.msra.gmra.mxu0 %vm812_vm0, %v1653_v19 }
 0x21d   : > { %1575 = vmatmul.mubr.msk.bf16.vlgmr.msra.gmra.mxu1 %vm812_vm0, %v1653_v19  ;;  %1149 = vmatprep.mubr.bf16.mxu0 %v1982_v1 }
 0x21e   : > { %1222 = vmatprep.mubr.bf16.mxu1 %v1982_v1 }
 0x224   : > { %1572 = vmatmul.mubr.msk.bf16.gmra.mxu0 %vm812_vm0, %v1654_v45 }
 0x225   : > { %1576 = vmatmul.mubr.msk.bf16.gmra.mxu1 %vm812_vm0, %v1654_v45  ;;  %1159 = vmatprep.mubr.bf16.mxu0 %v1982_v1 }
 0x226   : > { %1232 = vmatprep.mubr.bf16.mxu1 %v1982_v1 }
 0x22c   : > { %1573 = vmatmul.mubr.msk.bf16.gmra.mxu0 %vm812_vm0, %v1655_v15 }
 0x22d   : > { %1577 = vmatmul.mubr.msk.bf16.gmra.mxu1 %vm812_vm0, %v1655_v15  ;;  %1169 = vmatprep.mubr.bf16.mxu0 %v1982_v1 }
 0x22e   : > { %1242 = vmatprep.mubr.bf16.mxu1 %v1982_v1 }
 0x234   : > { %1574 = vmatmul.mubr.msk.bf16.gmra.mxu0 %vm812_vm0, %v1656_v16 }
 0x235   : > { %1578 = vmatmul.mubr.msk.bf16.gmra.mxu1 %vm812_vm0, %v1656_v16  ;;  %1359 = vmatprep.mubr.f32.mxu0 %v1983_v20 }
 0x236   : > { %1430 = vmatprep.mubr.f32.mxu1 %v1983_v20 }
 0x2dc   : > { %v1141_v29 = vpop.f32.mrf.mxu0 }
 0x2dd   : > { %v2435_v36 = vpop.f32.mrf.mxu1  ;;  %v1142_v35 = vadd.f32 %v1141_v29, %v2453_v53 }
 0x2de   : > { %v1143_v1 = vpop.f32.mrf.mxu0 }
 0x2df   : > { %v2439_v42 = vpop.f32.mrf.mxu1  ;;  %v1144_v33 = vadd.f32 %v1143_v1, %v2453_v53  ;;  %1785 = vtanh.f32 %v1142_v35 }
 0x2e0   : > { %v1145_v22 = vpop.f32.mrf.mxu0 }
 0x2e1   : > { %v2441_v44 = vpop.f32.mrf.mxu1  ;;  %v1146_v39 = vadd.f32 %v1145_v22, %v2458_v38  ;;  %1787 = vtanh.f32 %v1144_v33 }
 0x2e2   : > { %v1147_v46 = vpop.f32.mrf.mxu0 }
 0x2e3   : > { %v2445_v24 = vpop.f32.mrf.mxu1  ;;  %v1148_v30 = vadd.f32 %v1147_v46, %v2458_v38  ;;  %1789 = vtanh.f32 %v1146_v39 }
 0x2e4   : > { %v1151_v48 = vpop.f32.mrf.mxu0 }
 0x2e5   : > { %v2449_v54 = vpop.f32.mrf.mxu1  ;;  %v1152_v32 = vadd.f32 %v1151_v48, %v2443_v52  ;;  %1791 = vtanh.f32 %v1148_v30 }
 0x2e6   : > { %v1153_v55 = vpop.f32.mrf.mxu0 }
 0x2e7   : > { %v2451_v25 = vpop.f32.mrf.mxu1  ;;  %v1154_v62 = vadd.f32 %v1153_v55, %v2443_v52  ;;  %1793 = vtanh.f32 %v1152_v32 }
 0x2e8   : > { %v1155_v58 = vpop.f32.mrf.mxu0  ;;  %v1227_v33 = vadd.f32 %v2451_v25, %v2443_v52  ;;  %v1217_v25 = vadd.f32 %v2439_v42, %v2453_v53 }
 0x2e9   : > { %v2455_v56 = vpop.f32.mrf.mxu1  ;;  %v1156_v57 = vadd.f32 %v1155_v58, %v2447_v27  ;;  %1795 = vtanh.f32 %v1154_v62 }
 0x2ea   : > { %v1157_v51 = vpop.f32.mrf.mxu0 }
 0x2eb   : > { %v2461_v31 = vpop.f32.mrf.mxu1  ;;  %v1158_v59 = vadd.f32 %v1157_v51, %v2447_v27  ;;  %1797 = vtanh.f32 %v1156_v57  ;;  %v1229_v51 = vadd.f32 %v2455_v56, %v2447_v27 }
 0x2ec   : > { %v1161_v60 = vpop.f32.mrf.mxu0  ;;  %v2476_v12 = vpop.eup %1785  ;;  %v1231_v58 = vadd.f32 %v2461_v31, %v2447_v27  ;;  %v1221_v31 = vadd.f32 %v2445_v24, %v2458_v38  ;;  %v1219_v27 = vadd.f32 %v2441_v44, %v2458_v38 }
 0x2ed   : > { %v1234_v61 = vpop.f32.mrf.mxu1  ;;  %v1162_v43 = vadd.f32 %v1161_v60, %v2433_v34  ;;  %1799 = vtanh.f32 %v1158_v59 }
 0x2ee   : > { %v1163_v49 = vpop.f32.mrf.mxu0  ;;  %v2480_v18 = vpop.eup %1787  ;;  %v1235_v55 = vadd.f32 %v1234_v61, %v2433_v34 }
 0x2ef   : > { %v1236_v63 = vpop.f32.mrf.mxu1  ;;  %v1164_v0 = vadd.f32 %v1163_v49, %v2433_v34  ;;  %1801 = vtanh.f32 %v1162_v43  ;;  %v1285_v43 = vld [vmem:[%s2539_s7] sm:$0xff] }
 0x2f0   : > { %v1165_v26 = vpop.f32.mrf.mxu0  ;;  %v2484_v15 = vpop.eup %1789  ;;  %v1237_v48 = vadd.f32 %v1236_v63, %v2433_v34  ;;  %v1225_v34 = vadd.f32 %v2449_v54, %v2443_v52  ;;  %v1215_v52 = vadd.f32 %v2435_v36, %v2453_v53 }
 0x2f1   : > { %v1238_v47 = vpop.f32.mrf.mxu1  ;;  %v1166_v3 = vadd.f32 %v1165_v26, %v2437_v50  ;;  %1803 = vtanh.f32 %v1164_v0 }
 0x2f2   : > { %v1167_v41 = vpop.f32.mrf.mxu0  ;;  %v2487_v20 = vpop.eup %1791  ;;  %v1239_v22 = vadd.f32 %v1238_v47, %v2437_v50 }
 0x2f3   : > { %v1240_v2 = vpop.f32.mrf.mxu1  ;;  %v1168_v5 = vadd.f32 %v1167_v41, %v2437_v50  ;;  %1805 = vtanh.f32 %v1166_v3 }
 0x2f4   : > { %v1171_v4 = vpop.f32.mrf.mxu0  ;;  %v1241_v29 = vadd.f32 %v1240_v2, %v2437_v50  ;;  %v2490_v1 = vpop.eup %1793 }
 0x2f5   : > { %v1244_v6 = vpop.f32.mrf.mxu1  ;;  %v1172_v40 = vadd.f32 %v1171_v4, %v2429_v21  ;;  %1807 = vtanh.f32 %v1168_v5  ;;  %v1290_v2 = vpop.permute.xlu0 %1289 }
 0x2f6   : > { %v1173_v7 = vpop.f32.mrf.mxu0  ;;  %v1245_v16 = vadd.f32 %v1244_v6, %v2429_v21  ;;  %v2493_v46 = vpop.eup %1795 }
 0x2f7   : > { %v1174_v8 = vadd.f32 %v1173_v7, %v2429_v21  ;;  %v1246_v9 = vpop.f32.mrf.mxu1  ;;  %1809 = vtanh.f32 %v1172_v40 }
 0x2f8   : > { %v1175_v10 = vpop.f32.mrf.mxu0  ;;  %v1247_v19 = vadd.f32 %v1246_v9, %v2429_v21 }
 0x2f9   : > { %v1176_v11 = vadd.f32 %v1175_v10, %v2431_v28  ;;  %v1248_v23 = vpop.f32.mrf.mxu1  ;;  %1811 = vtanh.f32 %v1174_v8 }
 0x2fa   : > { %v1177_v37 = vpop.f32.mrf.mxu0  ;;  %v1249_v13 = vadd.f32 %v1248_v23, %v2431_v28 }
 0x2fb   : > { %v1178_v14 = vadd.f32 %v1177_v37, %v2431_v28  ;;  %v1250_v17 = vpop.f32.mrf.mxu1  ;;  %1813 = vtanh.f32 %v1176_v11 }
 0x2fc   : > { %v1251_v45 = vadd.f32 %v1250_v17, %v2431_v28  ;;  %v1798_v28 = vpop.eup %1797 }
 0x2fd   : > { %1815 = vtanh.f32 %v1178_v14  ;;  %v1800_v21 = vpop.eup %1799 }
 0x2fe   : > { %1817 = vtanh.f32 %v1251_v45  ;;  %v1802_v35 = vpop.eup %1801 }
 0x2ff   : > { %1819 = vtanh.f32 %v1249_v13  ;;  %v1804_v50 = vpop.eup %1803 }
 0x300   : > { %1821 = vtanh.f32 %v1247_v19  ;;  %v1806_v39 = vpop.eup %1805 }
 0x301   : > { %1823 = vtanh.f32 %v1245_v16 }
 0x302   : > { %1825 = vtanh.f32 %v1241_v29  ;;  %v1808_v60 = vpop.eup %1807 }
 0x303   : > { %1827 = vtanh.f32 %v1239_v22 }
 0x304   : > { %1829 = vtanh.f32 %v1237_v48  ;;  %v1810_v30 = vpop.eup %1809 }
 0x305   : > { %1831 = vtanh.f32 %v1235_v55 }
 0x306   : > { %1833 = vtanh.f32 %v1231_v58  ;;  %v1812_v56 = vpop.eup %1811 }
 0x307   : > { %1835 = vtanh.f32 %v1229_v51 }
 0x308   : > { %1837 = vtanh.f32 %v1227_v33  ;;  %v1814_v61 = vpop.eup %1813 }
 0x309   : > { %1839 = vtanh.f32 %v1225_v34 }
 0x30a   : > { %v1816_v54 = vpop.eup %1815  ;;  %1841 = vtanh.f32 %v1221_v31 }
 0x30b   : > { %v1818_v32 = vpop.eup %1817  ;;  %1843 = vtanh.f32 %v1219_v27  ;;  %1311 = vmatprep.subr.mxu0 %v1816_v54 }
 0x30c   : > { %v1820_v24 = vpop.eup %1819  ;;  %1845 = vtanh.f32 %v1217_v25  ;;  %1382 = vmatprep.subr.mxu1 %v1818_v32  ;;  %1312 = vmatpush1.msra.mxu0 %v1814_v61 }
 0x30d   : > { %v1822_v44 = vpop.eup %1821  ;;  %1847 = vtanh.f32 %v1215_v52  ;;  %1383 = vmatpush1.msra.mxu1 %v1820_v24  ;;  %1313 = vmatprep.subr.mxu0 %v1812_v56 }
 0x30e   : > { %v1824_v42 = vpop.eup %1823  ;;  %1384 = vmatprep.subr.mxu1 %v1822_v44  ;;  %1314 = vmatpush1.msra.mxu0 %v1810_v30 }
 0x30f   : > { %v1826_v38 = vpop.eup %1825  ;;  %1385 = vmatpush1.msra.mxu1 %v1824_v42  ;;  %1315 = vmatprep.subr.mxu0 %v1808_v60 }
 0x310   : > { %v1828_v36 = vpop.eup %1827  ;;  %1386 = vmatprep.subr.mxu1 %v1826_v38  ;;  %1316 = vmatpush1.msra.mxu0 %v1806_v39 }
 0x311   : > { %v1830_v53 = vpop.eup %1829  ;;  %1387 = vmatpush1.msra.mxu1 %v1828_v36  ;;  %1317 = vmatprep.subr.mxu0 %v1804_v50 }
 0x312   : > { %v1832_v49 = vpop.eup %1831  ;;  %1388 = vmatprep.subr.mxu1 %v1830_v53  ;;  %1318 = vmatpush1.msra.mxu0 %v1802_v35 }
 0x313   : > { %v1834_v62 = vpop.eup %1833  ;;  %1389 = vmatpush1.msra.mxu1 %v1832_v49  ;;  %1319 = vmatprep.subr.mxu0 %v1800_v21 }
 0x314   : > { %v1836_v63 = vpop.eup %1835  ;;  %1390 = vmatprep.subr.mxu1 %v1834_v62  ;;  %1320 = vmatpush1.msra.mxu0 %v1798_v28 }
 0x315   : > { %v1838_v57 = vpop.eup %1837  ;;  %1391 = vmatpush1.msra.mxu1 %v1836_v63  ;;  %1321 = vmatprep.subr.mxu0 %v2493_v46 }
 0x316   : > { %v1840_v26 = vpop.eup %1839  ;;  %1392 = vmatprep.subr.mxu1 %v1838_v57  ;;  %1322 = vmatpush1.msra.mxu0 %v2490_v1 }
 0x317   : > { %v1842_v59 = vpop.eup %1841  ;;  %1393 = vmatpush1.msra.mxu1 %v1840_v26  ;;  %1323 = vmatprep.subr.mxu0 %v2487_v20 }
 0x318   : > { %v1844_v47 = vpop.eup %1843  ;;  %1394 = vmatprep.subr.mxu1 %v1842_v59  ;;  %1324 = vmatpush1.msra.mxu0 %v2484_v15 }
 0x319   : > { %v1846_v41 = vpop.eup %1845  ;;  %1395 = vmatpush1.msra.mxu1 %v1844_v47  ;;  %1325 = vmatprep.subr.mxu0 %v2480_v18 }
 0x31a   : > { %v1848_v0 = vpop.eup %1847  ;;  %1396 = vmatprep.subr.mxu1 %v1846_v41  ;;  %1326 = vmatpush1.msra.mxu0 %v2476_v12 }
 0x31b   : > { %1397 = vmatpush1.msra.mxu1 %v1848_v0  ;;  %1579 = vmatmul.mubr.msk.f32.vlgmr.msra.gmra.mxu0 %vm812_vm0, %v1285_v43 }
 0x31c   : > { %1580 = vmatmul.mubr.msk.f32.vlgmr.msra.gmra.mxu1 %vm812_vm0, %v1285_v43 }
 0x3db   : > { %v1361_v3 = vpop.f32.mrf.mxu0 }
 0x3dc   : > { %v1362_v4 = vadd.f32 %v1361_v3, %v1290_v2  ;;  %v1432_v5 = vpop.f32.mrf.mxu1 }
 0x3dd   : > { %v1363_v6 = vpop.f32.mrf.mxu0  ;;  %v1433_v8 = vadd.f32 %v1432_v5, %v1290_v2 }
 0x3de   : > { %1437 = vst [vmem:[%s393_s18] sm:$0xff] %v1362_v4  ;;  %v1364_v40 = vadd.f32 %v1363_v6, %v1290_v2  ;;  %v1434_v7 = vpop.f32.mrf.mxu1 }
 0x3df   : > { %v1435_v9 = vadd.f32 %v1434_v7, %v1290_v2  ;;  %1439 = vst [vmem:[%s393_s18 + $0x10] sm:$0xff] %v1433_v8 }
 0x3e0   : > { %1438 = vst [vmem:[%s393_s18 + $0x8] sm:$0xff] %v1364_v40 }
 0x3e1   : > { %1440 = vst [vmem:[%s393_s18 + $0x18] sm:$0xff] %v1435_v9 }
 0x3e2 PF: > { %s22_s30 = sadd.s32 1, %s1971_s30  }
 0x3e3   : > { %p19_p3 = scmp.ge.s32.totalorder %s22_s30, 4  }
 0x3e5   :  { %21 = sbr.rel (!%p19_p3) target bundleno = 3 (0x3), region = 103 }
 0x3ea   :  { %1463 = vsyncpa [#allocation3], 1 }
 0x3eb   :  { %1465 = vsyncpa [#allocation3 + $0x1], 1 }
 0x3ec   :  { %1466 = vsyncpa [#allocation5], 1 }
 0x3ed   :  { %1467 = vsyncpa [#allocation8], 1 }

</bundles_post_ra>
